<compile_context>
chip_gen: v7x
topology: tpu7x:2x2x1
jax: 0.10.0
libtpu: 0.0.40
codegen_flags: <defaults>
</compile_context>

<pallas_src>
import functools
import math

import jax
import jax.numpy as jnp
from jax import lax
from jax.experimental import pallas as pl
from jax.experimental.pallas import tpu as pltpu


def _lightn_kernel(x_ref, w1a_ref, w1b_ref, b1_ref, w2_ref, b2_ref,
                   out_ref, attn_ref, *, inv_sqrt_c, mxu_dtype):
    bb, n, c = x_ref.shape
    xb = x_ref[...]                                   # (Bb, N, C), input dtype
    xb_f32 = xb.astype(jnp.float32)                   # residual path stays f32
    xb_mxu = xb.astype(mxu_dtype)                     # MXU input dtype (bf16)

    # energy[b,i,j] = sum_c x[b,i,c] * x[b,j,c]  — contraction fed directly to the MXU
    # (no explicit transpose / XLU traffic), f32 accumulation.
    energy = lax.dot_general(
        xb_mxu, xb_mxu,
        dimension_numbers=(((2,), (2,)), ((0,), (0,))),
        preferred_element_type=jnp.float32) * inv_sqrt_c            # (Bb, N, N)

    # Row-wise softmax (dim=-1) in f32; reciprocal goes to the EUP slot.
    m = jnp.max(energy, axis=-1, keepdims=True)
    e = jnp.exp(energy - m)
    attn = e * pl.reciprocal(jnp.sum(e, axis=-1, keepdims=True), approx=True)
    attn_ref[...] = attn.astype(attn_ref.dtype)

    # torch: x_r(C,N) = x(C,N) @ attention(N,N)  ->  (N,C) layout: x_r = attention^T @ P.
    # Expressed by contracting attention's *first* point axis (no attn.T materialized).
    xr = lax.dot_general(
        attn.astype(mxu_dtype), xb_mxu,
        dimension_numbers=(((1,), (1,)), ((0,), (0,))),
        preferred_element_type=jnp.float32)                         # (Bb, N, C)

    # Point-wise convs: collapse (Bb, N) into one row axis so the MXU sees a single
    # (Bb*N, C) @ (C, C) matmul per weight instead of Bb tiny M=N tiles.
    p2 = xb_f32.reshape(bb * n, c)                                  # (Bb*N, C) f32
    h = (jnp.dot(p2.astype(mxu_dtype), w1a_ref[...],
                 preferred_element_type=jnp.float32)
         + jnp.dot(xr.reshape(bb * n, c).astype(mxu_dtype), w1b_ref[...],
                   preferred_element_type=jnp.float32)
         + b1_ref[...])                                             # (Bb*N, C)

    y = p2 + h                                                      # residual in f32
    out = (jnp.dot(y.astype(mxu_dtype), w2_ref[...],
                   preferred_element_type=jnp.float32)
           + b2_ref[...])                                           # (Bb*N, C)
    out_ref[...] = out.reshape(bb, n, c).astype(out_ref.dtype)


def _pick_block_b(batch, target=8):
    """Largest divisor of `batch` that is <= target (batch elements per grid step)."""
    bb = 1
    for d in range(1, min(batch, target) + 1):
        if batch % d == 0:
            bb = d
    return bb


def lightn_forward(x, w1, b1, w2, b2, *, mxu_dtype=jnp.bfloat16, block_b=None):
    """x: (B, N, C); w1: (C, 2C); b1: (C,); w2: (C, C); b2: (C,)."""
    B, N, C = x.shape
    assert w1.shape == (C, 2 * C) and b1.shape == (C,)
    assert w2.shape == (C, C) and b2.shape == (C,)

    if block_b is None:
        block_b = _pick_block_b(B, target=8)
    assert B % block_b == 0
    grid_b = B // block_b

    # Pre-transpose conv weights into right-multiply matrices; cast to MXU input dtype.
    w1a = jnp.transpose(w1[:, :C]).astype(mxu_dtype)       # (C, C)  acts on x
    w1b = jnp.transpose(w1[:, C:]).astype(mxu_dtype)       # (C, C)  acts on x_r
    w2t = jnp.transpose(w2).astype(mxu_dtype)              # (C, C)
    b1r = b1.reshape(1, C).astype(jnp.float32)
    b2r = b2.reshape(1, C).astype(jnp.float32)

    kernel = functools.partial(_lightn_kernel,
                               inv_sqrt_c=float(1.0 / math.sqrt(C)),
                               mxu_dtype=mxu_dtype)

    # Advisory cost estimate for XLA scheduling.
    itemsize = x.dtype.itemsize
    flops = B * (4 * N * N * C + 6 * N * C * C)
    transcendentals = B * N * N
    bytes_accessed = (B * N * C * itemsize                        # x in
                      + 3 * C * C * jnp.dtype(mxu_dtype).itemsize # weights
                      + 2 * C * 4                                 # biases
                      + B * N * C * itemsize                      # out
                      + B * N * N * itemsize)                     # attention
    cost = pl.CostEstimate(flops=flops,
                           transcendentals=transcendentals,
                           bytes_accessed=bytes_accessed)

    # VMEM budget: double-buffered x / out / attn blocks (+ headroom for intermediates).
    # Clamped to [32 MiB, 64 MiB] so it is valid on v5e/v6e/v7x alike.
    blk_bytes = 2 * (block_b * N * C * itemsize       # x block
                     + block_b * N * C * itemsize     # out block
                     + block_b * N * N * itemsize)    # attn block
    vmem_limit = int(min(64 * 1024 * 1024, max(32 * 1024 * 1024, 4 * blk_bytes)))

    grid_spec = pltpu.PrefetchScalarGridSpec(
        num_scalar_prefetch=0,
        grid=(grid_b,),
        in_specs=[
            pl.BlockSpec((block_b, N, C), lambda b: (b, 0, 0)),   # x (block_b batches/step)
            pl.BlockSpec((C, C), lambda b: (0, 0)),               # W1a (constant -> fetched once)
            pl.BlockSpec((C, C), lambda b: (0, 0)),               # W1b
            pl.BlockSpec((1, C), lambda b: (0, 0)),               # b1
            pl.BlockSpec((C, C), lambda b: (0, 0)),               # W2
            pl.BlockSpec((1, C), lambda b: (0, 0)),               # b2
        ],
        out_specs=[
            pl.BlockSpec((block_b, N, C), lambda b: (b, 0, 0)),   # aggregated features
            pl.BlockSpec((block_b, N, N), lambda b: (b, 0, 0)),   # attention
        ],
    )

    out, attn = pl.pallas_call(
        kernel,
        out_shape=(jax.ShapeDtypeStruct((B, N, C), x.dtype),
                   jax.ShapeDtypeStruct((B, N, N), x.dtype)),
        grid_spec=grid_spec,
        compiler_params=pltpu.CompilerParams(
            dimension_semantics=("parallel",),     # shards batch blocks across TCs on v7x
            vmem_limit_bytes=vmem_limit),
        cost_estimate=cost,
    )(x, w1a, w1b, b1r, w2t, b2r)
    return out, attn


def lightn_reference(x, w1, b1, w2, b2, mxu_dtype=None):
    """Pure-JAX mirror of the PyTorch forward.  If `mxu_dtype` is given, matmul inputs
    are cast to it (mirroring the kernel's bf16 MXU path) with f32 accumulation."""
    B, N, C = x.shape
    f32 = jnp.float32
    cast = (lambda a: a.astype(mxu_dtype)) if mxu_dtype is not None else (lambda a: a)

    xt = jnp.transpose(x, (0, 2, 1))                                   # (B, C, N)
    energy = jnp.einsum('bnc,bcm->bnm', cast(x), cast(xt),
                        preferred_element_type=f32) / math.sqrt(C)     # (B, N, N)
    attention = jax.nn.softmax(energy, axis=-1)
    x_r = jnp.einsum('bcn,bnm->bcm', cast(xt), cast(attention),
                     preferred_element_type=f32)                       # (B, C, N)
    cat = jnp.concatenate([xt.astype(f32), x_r], axis=1)               # (B, 2C, N)
    h = jnp.einsum('oc,bcn->bon', cast(w1), cast(cat),
                   preferred_element_type=f32) + b1[None, :, None]     # Conv1d(2C->C,1)
    out = jnp.einsum('oc,bcn->bon', cast(w2), cast(xt.astype(f32) + h),
                     preferred_element_type=f32) + b2[None, :, None]   # FFN Conv1d(C->C,1)
    return jnp.transpose(out, (0, 2, 1)).astype(x.dtype), attention.astype(x.dtype)


if __name__ == "__main__":
    B, N, C = 2, 8, 32

    key = jax.random.PRNGKey(0)
    kx, kw1, kb1, kw2, kb2 = jax.random.split(key, 5)

    x = jax.random.normal(kx, (B, N, C), dtype=jnp.float32)
    # Deterministic synthetic parameters (PyTorch Conv1d shapes with kernel dim squeezed).
    w1 = jax.random.normal(kw1, (C, 2 * C), dtype=jnp.float32) * 0.1  # Conv1d(2C, C, 1).weight
    b1 = jax.random.normal(kb1, (C,), dtype=jnp.float32) * 0.1        # Conv1d(2C, C, 1).bias
    w2 = jax.random.normal(kw2, (C, C), dtype=jnp.float32) * 0.1      # Conv1d(C, C, 1).weight
    b2 = jax.random.normal(kb2, (C,), dtype=jnp.float32) * 0.1        # Conv1d(C, C, 1).bias

    out, attn = lightn_forward(x, w1, b1, w2, b2)
    jax.block_until_ready((out, attn))

    # Check against a precision-matched (bf16 matmul-input) reference ...
    ref_out_m, ref_attn_m = lightn_reference(x, w1, b1, w2, b2, mxu_dtype=jnp.bfloat16)
    assert jnp.allclose(out, ref_out_m, atol=1e-2, rtol=1e-2), "output mismatch (bf16-matched ref)"
    assert jnp.allclose(attn, ref_attn_m, atol=1e-2, rtol=1e-2), "attention mismatch (bf16-matched ref)"

    # ... and loosely against the full-f32 reference (bf16 MXU inputs => looser tolerance).
    ref_out, ref_attn = lightn_reference(x, w1, b1, w2, b2)
    assert jnp.allclose(out, ref_out, atol=1e-1, rtol=1e-1), "output mismatch (f32 ref)"
    assert jnp.allclose(attn, ref_attn, atol=5e-2, rtol=5e-2), "attention mismatch (f32 ref)"

    print("KERNEL_OK")
</pallas_src>

<mosaic_0001>
module attributes {stable_mosaic.version = 11 : i64} {
  func.func @_lightn_kernel(%arg0: i32, %arg1: memref<2x8x32xf32, #tpu.memory_space<vmem>>, %arg2: memref<32x32xbf16, #tpu.memory_space<vmem>>, %arg3: memref<32x32xbf16, #tpu.memory_space<vmem>>, %arg4: memref<1x32xf32, #tpu.memory_space<vmem>>, %arg5: memref<32x32xbf16, #tpu.memory_space<vmem>>, %arg6: memref<1x32xf32, #tpu.memory_space<vmem>>, %arg7: memref<2x8x32xf32, #tpu.memory_space<vmem>>, %arg8: memref<2x8x8xf32, #tpu.memory_space<vmem>>) attributes {dimension_semantics = [#tpu.dimension_semantics<parallel>], iteration_bounds = array<i64: 1>, scalar_prefetch = 0 : i64, scratch_operands = 0 : i64, tpu.core_type = #tpu.core_type<tc>, window_params = [{transform_indices = @transform_0, window_bounds = array<i64: 2, 8, 32>}, {pipeline_mode = #tpu.pipeline_mode<synchronous>, transform_indices = @transform_1, window_bounds = array<i64: 32, 32>}, {pipeline_mode = #tpu.pipeline_mode<synchronous>, transform_indices = @transform_2, window_bounds = array<i64: 32, 32>}, {pipeline_mode = #tpu.pipeline_mode<synchronous>, transform_indices = @transform_3, window_bounds = array<i64: 1, 32>}, {pipeline_mode = #tpu.pipeline_mode<synchronous>, transform_indices = @transform_4, window_bounds = array<i64: 32, 32>}, {pipeline_mode = #tpu.pipeline_mode<synchronous>, transform_indices = @transform_5, window_bounds = array<i64: 1, 32>}, {transform_indices = @transform_6, window_bounds = array<i64: 2, 8, 32>}, {transform_indices = @transform_7, window_bounds = array<i64: 2, 8, 8>}]} {
    %c0 = arith.constant 0 : index
    %c0_0 = arith.constant 0 : index
    %c0_1 = arith.constant 0 : index
    %0 = vector.load %arg1[%c0, %c0_0, %c0_1] : memref<2x8x32xf32, #tpu.memory_space<vmem>>, vector<2x8x32xf32>
    %1 = arith.truncf %0 : vector<2x8x32xf32> to vector<2x8x32xbf16>
    %cst = arith.constant dense<0.000000e+00> : vector<2x8x8xf32>
    %2 = tpu.matmul %1, %1, %cst {dimension_numbers = #tpu.dot_dimension_numbers<[2], [2], [1], [1], [0, 0, 0, 1, 1, 1], [0], [0]>} : vector<2x8x32xbf16>, vector<2x8x32xbf16>, vector<2x8x8xf32> -> vector<2x8x8xf32>
    %cst_2 = arith.constant 0.176776692 : f32
    %3 = vector.broadcast %cst_2 : f32 to vector<2x8x8xf32>
    %4 = arith.mulf %2, %3 : vector<2x8x8xf32>
    %cst_3 = arith.constant dense<0xFF800000> : vector<2x8xf32>
    %5 = vector.multi_reduction <maximumf>, %4, %cst_3 [2] : vector<2x8x8xf32> to vector<2x8xf32>
    %6 = vector.shape_cast %5 : vector<2x8xf32> to vector<2x8x1xf32>
    %7 = vector.broadcast %6 : vector<2x8x1xf32> to vector<2x8x8xf32>
    %8 = arith.subf %4, %7 : vector<2x8x8xf32>
    %9 = math.exp %8 : vector<2x8x8xf32>
    %cst_4 = arith.constant dense<0.000000e+00> : vector<2x8xf32>
    %10 = vector.multi_reduction <add>, %9, %cst_4 [2] : vector<2x8x8xf32> to vector<2x8xf32>
    %11 = vector.shape_cast %10 : vector<2x8xf32> to vector<2x8x1xf32>
    %12 = tpu.reciprocal %11 {approx = true} : vector<2x8x1xf32> -> vector<2x8x1xf32>
    %13 = vector.broadcast %12 : vector<2x8x1xf32> to vector<2x8x8xf32>
    %14 = arith.mulf %9, %13 : vector<2x8x8xf32>
    %c0_5 = arith.constant 0 : index
    %c0_6 = arith.constant 0 : index
    %c0_7 = arith.constant 0 : index
    %15 = vector.load %arg8[%c0_5, %c0_6, %c0_7] : memref<2x8x8xf32, #tpu.memory_space<vmem>>, vector<2x8x8xf32>
    tpu.vector_store %arg8[%c0_5, %c0_6, %c0_7], %14 {strides = array<i32>} : memref<2x8x8xf32, #tpu.memory_space<vmem>>, vector<2x8x8xf32>,
    %16 = arith.truncf %14 : vector<2x8x8xf32> to vector<2x8x8xbf16>
    %cst_8 = arith.constant dense<0.000000e+00> : vector<2x8x32xf32>
    %17 = tpu.matmul %16, %1, %cst_8 {dimension_numbers = #tpu.dot_dimension_numbers<[1], [1], [2], [2], [0, 0, 0, 2, 1, 2], [0], [0]>} : vector<2x8x8xbf16>, vector<2x8x32xbf16>, vector<2x8x32xf32> -> vector<2x8x32xf32>
    %18 = vector.shape_cast %0 : vector<2x8x32xf32> to vector<16x32xf32>
    %19 = arith.truncf %18 : vector<16x32xf32> to vector<16x32xbf16>
    %c0_9 = arith.constant 0 : index
    %c0_10 = arith.constant 0 : index
    %20 = vector.load %arg2[%c0_9, %c0_10] : memref<32x32xbf16, #tpu.memory_space<vmem>>, vector<32x32xbf16>
    %cst_11 = arith.constant dense<0.000000e+00> : vector<16x32xf32>
    %21 = tpu.matmul %19, %20, %cst_11 {dimension_numbers = #tpu.dot_dimension_numbers<[1], [0], [0], [1], [0, 0, 1, 1], [], []>} : vector<16x32xbf16>, vector<32x32xbf16>, vector<16x32xf32> -> vector<16x32xf32>
    %22 = vector.shape_cast %17 : vector<2x8x32xf32> to vector<16x32xf32>
    %23 = arith.truncf %22 : vector<16x32xf32> to vector<16x32xbf16>
    %c0_12 = arith.constant 0 : index
    %c0_13 = arith.constant 0 : index
    %24 = vector.load %arg3[%c0_12, %c0_13] : memref<32x32xbf16, #tpu.memory_space<vmem>>, vector<32x32xbf16>
    %cst_14 = arith.constant dense<0.000000e+00> : vector<16x32xf32>
    %25 = tpu.matmul %23, %24, %cst_14 {dimension_numbers = #tpu.dot_dimension_numbers<[1], [0], [0], [1], [0, 0, 1, 1], [], []>} : vector<16x32xbf16>, vector<32x32xbf16>, vector<16x32xf32> -> vector<16x32xf32>
    %26 = arith.addf %21, %25 : vector<16x32xf32>
    %c0_15 = arith.constant 0 : index
    %c0_16 = arith.constant 0 : index
    %27 = vector.load %arg4[%c0_15, %c0_16] : memref<1x32xf32, #tpu.memory_space<vmem>>, vector<1x32xf32>
    %28 = vector.broadcast %27 : vector<1x32xf32> to vector<16x32xf32>
    %29 = arith.addf %26, %28 : vector<16x32xf32>
    %30 = arith.addf %18, %29 : vector<16x32xf32>
    %31 = arith.truncf %30 : vector<16x32xf32> to vector<16x32xbf16>
    %c0_17 = arith.constant 0 : index
    %c0_18 = arith.constant 0 : index
    %32 = vector.load %arg5[%c0_17, %c0_18] : memref<32x32xbf16, #tpu.memory_space<vmem>>, vector<32x32xbf16>
    %cst_19 = arith.constant dense<0.000000e+00> : vector<16x32xf32>
    %33 = tpu.matmul %31, %32, %cst_19 {dimension_numbers = #tpu.dot_dimension_numbers<[1], [0], [0], [1], [0, 0, 1, 1], [], []>} : vector<16x32xbf16>, vector<32x32xbf16>, vector<16x32xf32> -> vector<16x32xf32>
    %c0_20 = arith.constant 0 : index
    %c0_21 = arith.constant 0 : index
    %34 = vector.load %arg6[%c0_20, %c0_21] : memref<1x32xf32, #tpu.memory_space<vmem>>, vector<1x32xf32>
    %35 = vector.broadcast %34 : vector<1x32xf32> to vector<16x32xf32>
    %36 = arith.addf %33, %35 : vector<16x32xf32>
    %37 = vector.shape_cast %36 : vector<16x32xf32> to vector<2x8x32xf32>
    %c0_22 = arith.constant 0 : index
    %c0_23 = arith.constant 0 : index
    %c0_24 = arith.constant 0 : index
    %38 = vector.load %arg7[%c0_22, %c0_23, %c0_24] : memref<2x8x32xf32, #tpu.memory_space<vmem>>, vector<2x8x32xf32>
    tpu.vector_store %arg7[%c0_22, %c0_23, %c0_24], %37 {strides = array<i32>} : memref<2x8x32xf32, #tpu.memory_space<vmem>>, vector<2x8x32xf32>,
    return
  }
  func.func @transform_0(%arg0: i32) -> (i32, i32, i32) {
    %c0_i32 = arith.constant 0 : i32
    %c0_i32_0 = arith.constant 0 : i32
    %c0_i32_1 = arith.constant 0 : i32
    return %arg0, %c0_i32, %c0_i32_0 : i32, i32, i32
  }
  func.func @transform_1(%arg0: i32) -> (i32, i32) {
    %c0_i32 = arith.constant 0 : i32
    %c0_i32_0 = arith.constant 0 : i32
    %c0_i32_1 = arith.constant 0 : i32
    return %c0_i32, %c0_i32_0 : i32, i32
  }
  func.func @transform_2(%arg0: i32) -> (i32, i32) {
    %c0_i32 = arith.constant 0 : i32
    %c0_i32_0 = arith.constant 0 : i32
    %c0_i32_1 = arith.constant 0 : i32
    return %c0_i32, %c0_i32_0 : i32, i32
  }
  func.func @transform_3(%arg0: i32) -> (i32, i32) {
    %c0_i32 = arith.constant 0 : i32
    %c0_i32_0 = arith.constant 0 : i32
    %c0_i32_1 = arith.constant 0 : i32
    return %c0_i32, %c0_i32_0 : i32, i32
  }
  func.func @transform_4(%arg0: i32) -> (i32, i32) {
    %c0_i32 = arith.constant 0 : i32
    %c0_i32_0 = arith.constant 0 : i32
    %c0_i32_1 = arith.constant 0 : i32
    return %c0_i32, %c0_i32_0 : i32, i32
  }
  func.func @transform_5(%arg0: i32) -> (i32, i32) {
    %c0_i32 = arith.constant 0 : i32
    %c0_i32_0 = arith.constant 0 : i32
    %c0_i32_1 = arith.constant 0 : i32
    return %c0_i32, %c0_i32_0 : i32, i32
  }
  func.func @transform_6(%arg0: i32) -> (i32, i32, i32) {
    %c0_i32 = arith.constant 0 : i32
    %c0_i32_0 = arith.constant 0 : i32
    %c0_i32_1 = arith.constant 0 : i32
    return %arg0, %c0_i32, %c0_i32_0 : i32, i32, i32
  }
  func.func @transform_7(%arg0: i32) -> (i32, i32, i32) {
    %c0_i32 = arith.constant 0 : i32
    %c0_i32_0 = arith.constant 0 : i32
    %c0_i32_1 = arith.constant 0 : i32
    return %arg0, %c0_i32, %c0_i32_0 : i32, i32, i32
  }
}

</mosaic_0001>

<bundles_post_ra>
// kernel: tpu_custom_call.1
= control target key start
LH: loop header
LB: loop body
LE: loop exit
PB: predicated region body
PF: predicated region fallthrough
CT: control target
= control target key end

     0   :  { %13 = vsyncpa [#allocation3], 0  ;;  %s1021_s0 = inlined_call_operand.hbm [shape: f32[2,8,32], index: 0, kind: input, shape index: {}]   ;;  %s1022_s1 = inlined_call_operand.hbm [shape: bf16[32,32], index: 1, kind: input, shape index: {}]   ;;  %s1023_s2 = inlined_call_operand.hbm [shape: bf16[32,32], index: 2, kind: input, shape index: {}]   ;;  %s1024_s3 = inlined_call_operand.vmem [shape: f32[1,32], index: 3, kind: input, shape index: {}]   ;;  %s1025_s4 = inlined_call_operand.hbm [shape: bf16[32,32], index: 4, kind: input, shape index: {}]   ;;  %s1026_s5 = inlined_call_operand.vmem [shape: f32[1,32], index: 5, kind: input, shape index: {}]   ;;  %s1027_s6 = inlined_call_operand.hbm [shape: f32[2,8,32], index: 6, kind: output, shape index: {0}]   ;;  %s1028_s7 = inlined_call_operand.hbm [shape: f32[2,8,8], index: 7, kind: output, shape index: {1}]  }
   0x1   :  { %14 = vsyncpa [#allocation6], 0 }
   0x2   :  { %15 = vsyncpa [#allocation9], 0 }
   0x3   :  { %16 = vsyncpa [#allocation4], 0 }
   0x4   :  { %17 = vsyncpa [#allocation12], 0  ;;  %s813_s24 = smov [#allocation5]   ;;  %s671_s28 = scalar_lea.hbm %s1022_s1, 256 }
   0x5   :  { %s35_s25 = sshll.u32 %s813_s24, 4  ;;  %p672_p0 = scmp.ne.s32.totalorder %s1022_s1, %s671_s28  ;;  %s36_s25 = int_to_ptr.vmem [resolvable:$true] %s35_s25 }
   0x6   :  { %p675_p1 = scmp.lt.u32.totalorder %s671_s28, %s1022_s1 }
   0x8   :  { %p677_p2 = pnand %p675_p1, %p672_p0 }
   0xa   :  { %680 = shalt.err (!%p677_p2)
}
   0xb   :  { %s681_s10 = scalar_lea.vmem %s36_s25, 256  ;;  %p686_p4 = scmp.lt.s32.totalorder %s36_s25, %s36_s25 }
   0xc   :  { %p682_p3 = scmp.ne.s32.totalorder %s36_s25, %s681_s10  ;;  %p687_p5 = scmp.lt.s32.totalorder %s681_s10, %s681_s10 }
   0xe   :  { %p688_p6 = por %p687_p5, %p686_p4 }
  0x10   :  { %p689_p7 = pnand %p688_p6, %p682_p3 }
  0x12   :  { %692 = shalt.err (!%p689_p7)
}
  0x13   :  { %s814_s11 = smov 64   ;;  %s815_s12 = smov 4  }
  0x14   :  { %41 = dma.hbm_to_vmem [thread:$0]  %s1022_s1, 256, %s36_s25, [#allocation6], %s814_s11, %s814_s11, %s815_s12  }
  0x15   :  { %s816_s15 = smov [#allocation2]   ;;  %s693_s19 = scalar_lea.hbm %s1021_s0, 256 }
  0x16   :  { %s23_s16 = sshll.u32 %s816_s15, 4  ;;  %p694_p8 = scmp.ne.s32.totalorder %s1021_s0, %s693_s19  ;;  %s24_s16 = int_to_ptr.vmem [resolvable:$true] %s23_s16 }
  0x17   :  { %p697_p9 = scmp.lt.u32.totalorder %s693_s19, %s1021_s0 }
  0x19   :  { %p699_p10 = pnand %p697_p9, %p694_p8 }
  0x1b   :  { %702 = shalt.err (!%p699_p10)
}
  0x1c   :  { %s703_s24 = scalar_lea.vmem %s24_s16, 256  ;;  %p708_p12 = scmp.lt.s32.totalorder %s24_s16, %s24_s16 }
  0x1d   :  { %p704_p11 = scmp.ne.s32.totalorder %s24_s16, %s703_s24  ;;  %p709_p13 = scmp.lt.s32.totalorder %s703_s24, %s703_s24 }
  0x1f   :  { %p710_p0 = por %p709_p13, %p708_p12 }
  0x21   :  { %p711_p1 = pnand %p710_p0, %p704_p11 }
  0x23   :  { %714 = shalt.err (!%p711_p1)
}
  0x24   :  { %s817_s1 = smov 128   ;;  %s818_s25 = smov 8  }
  0x25   :  { %29 = dma.hbm_to_vmem [thread:$0]  %s1021_s0, 256, %s24_s16, [#allocation3], %s817_s1, %s817_s1, %s818_s25  }
  0x26   :  { %s819_s28 = smov [#allocation7]   ;;  %s820_s30 = smov [#allocation8]  }
  0x27   :  { %s47_s29 = sshll.u32 %s819_s28, 4  ;;  %s61_s8 = sshll.u32 %s820_s30, 4  ;;  %s48_s29 = int_to_ptr.vmem [resolvable:$true] %s47_s29  ;;  %s895_s8 = int_to_ptr.vmem [resolvable:$true] %s61_s8 }
  0x28   :  { %s715_s13 = scalar_lea.hbm %s1023_s2, 256 }
  0x29   :  { %p716_p2 = scmp.ne.s32.totalorder %s1023_s2, %s715_s13  ;;  %p719_p3 = scmp.lt.u32.totalorder %s715_s13, %s1023_s2 }
  0x2b   :  { %p721_p4 = pnand %p719_p3, %p716_p2 }
  0x2d   :  { %724 = shalt.err (!%p721_p4)
}
  0x2e   :  { %s725_s0 = scalar_lea.vmem %s48_s29, 256  ;;  %p730_p6 = scmp.lt.s32.totalorder %s48_s29, %s48_s29 }
  0x2f   :  { %p726_p5 = scmp.ne.s32.totalorder %s48_s29, %s725_s0  ;;  %p731_p7 = scmp.lt.s32.totalorder %s725_s0, %s725_s0 }
  0x31   :  { %p732_p8 = por %p731_p7, %p730_p6 }
  0x33   :  { %p733_p9 = pnand %p732_p8, %p726_p5 }
  0x35   :  { %736 = shalt.err (!%p733_p9)
}
  0x36   :  { %53 = dma.hbm_to_vmem [thread:$0]  %s1023_s2, 256, %s48_s29, [#allocation6], %s814_s11, %s814_s11, %s815_s12  }
  0x37   :  { %s737_s22 = scalar_lea.hbm %s1025_s4, 256 }
  0x38   :  { %p738_p10 = scmp.ne.s32.totalorder %s1025_s4, %s737_s22  ;;  %p741_p11 = scmp.lt.u32.totalorder %s737_s22, %s1025_s4 }
  0x3a   :  { %p743_p12 = pnand %p741_p11, %p738_p10 }
  0x3c   :  { %746 = shalt.err (!%p743_p12)
}
  0x3d   :  { %s747_s28 = scalar_lea.vmem %s895_s8, 256  ;;  %p752_p0 = scmp.lt.s32.totalorder %s895_s8, %s895_s8 }
  0x3e   :  { %p748_p13 = scmp.ne.s32.totalorder %s895_s8, %s747_s28  ;;  %p753_p1 = scmp.lt.s32.totalorder %s747_s28, %s747_s28 }
  0x40   :  { %p754_p2 = por %p753_p1, %p752_p0 }
  0x42   :  { %p755_p3 = pnand %p754_p2, %p748_p13 }
  0x44   :  { %758 = shalt.err (!%p755_p3)
}
  0x45   :  { %67 = dma.hbm_to_vmem [thread:$0]  %s1025_s4, 256, %s895_s8, [#allocation9], %s814_s11, %s814_s11, %s815_s12  }
  0x46   :  { %803 = dma.done.wait [#allocation3], 256  }
  0x47   :  { %804 = vsyncadd [#allocation3], 4294967040 }
  0x48   :  { %805 = dma.done.wait [#allocation6], 512  }
  0x49   :  { %806 = vsyncadd [#allocation6], 4294966784 }
  0x4a   :  { %807 = dma.done.wait [#allocation9], 256  }
  0x4b   :  { %808 = vsyncadd [#allocation9], 4294967040  ;;  %v821_v0 = vmov 0.0   ;;  %vm822_vm0 = vmmov 0   ;;  %v938_v1 = vld [vmem:[#allocation2] sm:$0xff]  ;;  %vm87_vm1 = vcmask 261120  }
  0x4c   :  { %596 = vmatprep.subr.bf16.mxu0 %v821_v0  ;;  %602 = vmatprep.subr.bf16.mxu1 %v821_v0  ;;  %v940_v2 = vld [vmem:[#allocation2 + $0x8] sm:$0xff]  ;;  %v85_v3 = vpack.c.bf16 %v938_v1, %v938_v1  ;;  %vm176_vm2 = vcmask 64512   ;;  %vm222_vm3 = vcmask 1043456   ;;  %v658_v39 = vld [vmem:[#allocation7] sm:$0xff]   ;;  %v657_v41 = vld [vmem:[#allocation5] sm:$0xff]   ;;  %s823_s12 = smov [#allocation11]  }
  0x4d   :  { %598 = vmatprep.mubr.msk.bf16.mxu0 %vm822_vm0, %v821_v0  ;;  %604 = vmatprep.mubr.msk.bf16.mxu1 %vm822_vm0, %v821_v0  ;;  %v86_v4 = vpack.c.bf16 %v940_v2, %v940_v2  ;;  %v659_v43 = vld [vmem:[#allocation5 + $0x8] sm:$0xff]   ;;  %v326_v44 = vpack.c.bf16 %v940_v2, %v938_v1  ;;  %v660_v45 = vld [vmem:[#allocation7 + $0x8] sm:$0xff]   ;;  %v661_v59 = vld [vmem:[#allocation8] sm:$0xff]   ;;  %s546_s30 = sshll.u32 %s823_s12, 4  ;;  %s547_s30 = int_to_ptr.vmem [resolvable:$true] %s546_s30 }
  0x4e   :  { %v89_v5 = vsel %vm87_vm1, %v85_v3, 0  ;;  %v223_v29 = vsel %vm222_vm3, %v85_v3, 0  ;;  %v662_v60 = vld [vmem:[#allocation8 + $0x8] sm:$0xff]   ;;  %v574_v62 = vld [vmem:[%s1024_s3] ss:$0 sm:$0xff]  ;;  %s759_s8 = scalar_lea.vmem %s547_s30, 256  ;;  %p764_p5 = scmp.lt.s32.totalorder %s547_s30, %s547_s30 }
  0x4f   :  { %v132_v6 = vsel %vm87_vm1, %v86_v4, 0  ;;  %597 = vmatpush3.bf16.xpose.msra.mxu0 %v89_v5  ;;  %v284_v30 = vsel %vm222_vm3, %v86_v4, 0  ;;  %p760_p4 = scmp.ne.s32.totalorder %s547_s30, %s759_s8  ;;  %p765_p6 = scmp.lt.s32.totalorder %s759_s8, %s759_s8 }
  0x50   :  { %603 = vmatpush3.bf16.xpose.msra.mxu1 %v132_v6  ;;  %608 = vmatprep.subr.bf16.mxu0 %v821_v0 }
  0x51   :  { %614 = vmatprep.subr.bf16.mxu1 %v821_v0  ;;  %p766_p7 = por %p765_p6, %p764_p5 }
  0x53   :  { %p767_p8 = pnand %p766_p7, %p760_p4 }
  0x56   :  { %599 = vmatmul.mubr.msk.bf16.vlgmr.msra.gmra.mrb[0].mxu0 %vm87_vm1, %v85_v3 }
  0x57   :  { %605 = vmatmul.mubr.msk.bf16.vlgmr.msra.gmra.mrb[0].mxu1 %vm87_vm1, %v86_v4  ;;  %610 = vmatprep.mubr.msk.bf16.mxu0 %vm822_vm0, %v821_v0 }
  0x58   :  { %616 = vmatprep.mubr.msk.bf16.mxu1 %vm822_vm0, %v821_v0  ;;  %609 = vmatpush3.bf16.msra.mxu0 %v223_v29 }
  0x59   :  { %615 = vmatpush3.bf16.msra.mxu1 %v284_v30  ;;  %620 = vmatprep.subr.bf16.mxu0 %v821_v0 }
  0x5a   :  { %628 = vmatprep.subr.bf16.mxu1 %v821_v0 }
 0x129   :  { %v125_v7 = vpop.f32.mrb[0].mxu0 }
 0x12a   :  { %v168_v8 = vpop.f32.mrb[0].mxu1  ;;  %v174_v9 = vmul.f32 0.17677669, %v125_v7  ;;  %v600_v10 = vpop.f32.mrb[1].mxu0 }
 0x12b   :  { %v175_v11 = vmul.f32 0.17677669, %v168_v8  ;;  %v606_v12 = vpop.f32.mrb[1].mxu1  ;;  %v128_v13 = vpop.f32.mrb[2].mxu0 }
 0x12c   :  { %v171_v14 = vpop.f32.mrb[2].mxu1  ;;  %v601_v15 = vpop.f32.mrb[3].mxu0  ;;  %v177_v17 = vsel %vm176_vm2, %v174_v9, -inf }
 0x12d   :  { %v607_v16 = vpop.f32.mrb[3].mxu1  ;;  %178 = vmax.xlane.f32.xlu0 %v177_v17  ;;  %v180_v18 = vsel %vm176_vm2, %v175_v11, -inf }
 0x131   :  { %181 = vmax.xlane.f32.xlu0 %v180_v18 }
 0x1ba   :  { %v179_v19 = vpop.xlane.xlu0 %178 }
 0x1bb   :  { %v183_v20 = vsub.f32 %v174_v9, %v179_v19 }
 0x1bd   :  { %v185_v21 = vmul.f32 1.442695, %v183_v20 }
 0x1be   :  { %v182_v22 = vpop.xlane.xlu0 %181 }
 0x1bf   :  { %663 = vpow2.f32 %v185_v21  ;;  %v184_v23 = vsub.f32 %v175_v11, %v182_v22 }
 0x1c1   :  { %v187_v24 = vmul.f32 1.442695, %v184_v23 }
 0x1c3   :  { %665 = vpow2.f32 %v187_v24 }
 0x1c9   :  { %v664_v25 = vpop.eup %663 }
 0x1ca   :  { %v189_v26 = vsel %vm176_vm2, %v664_v25, 0.0 }
 0x1cb   :  { %190 = vadd.xlane.f32.xlu1 %v189_v26 }
 0x1cd   :  { %v666_v27 = vpop.eup %665 }
 0x1ce   :  { %v192_v28 = vsel %vm176_vm2, %v666_v27, 0.0 }
 0x1cf   :  { %193 = vadd.xlane.f32.xlu1 %v192_v28 }
 0x258   :  { %v191_v31 = vpop.xlane.xlu1 %190 }
 0x259   :  { %667 = vrcp.f32 %v191_v31 }
 0x25c   :  { %v194_v32 = vpop.xlane.xlu1 %193 }
 0x25d   :  { %669 = vrcp.f32 %v194_v32 }
 0x263   :  { %v668_v33 = vpop.eup %667 }
 0x264   :  { %v197_v34 = vmul.f32 %v668_v33, %v664_v25 }
 0x266   :  { %v201_v35 = vpack.c.bf16 %v197_v34, %v197_v34  ;;  %199 = vst.msk [vmem:[#allocation11] sm:$0xff] %vm176_vm2, %v197_v34 }
 0x267   :  { %v670_v36 = vpop.eup %669 }
 0x268   :  { %203 = vxpose.xlu0.c.b16.start.end [1/1] (short) (narrow) %v201_v35, 16  ;;  %v198_v37 = vmul.f32 %v670_v36, %v666_v27 }
 0x26a   :  { %v202_v38 = vpack.c.bf16 %v198_v37, %v198_v37  ;;  %200 = vst.msk [vmem:[#allocation11 + $0x8] sm:$0xff] %vm176_vm2, %v198_v37 }
 0x26c   :  { %265 = vxpose.xlu1.c.b16.start.end [1/1] (short) (narrow) %v202_v38, 16 }
 0x2ce   :  { %v211_v40 = vpop.trf.xlu0 }
 0x2cf   :  { %611 = vmatmul.mubr.msk.bf16.vlgmr.msra.gmra.mrb[4].mxu0 %vm176_vm2, %v211_v40 }
 0x2d0   :  { %621 = vmatpush3.bf16.msra.mxu0 %v658_v39  ;;  %624 = vmatprep.mubr.msk.bf16.mxu0 %vm822_vm0, %v821_v0 }
 0x2d1   :  { %622 = vmatprep.subr.bf16.mxu0 %v821_v0 }
 0x2d2   :  { %v273_v42 = vpop.trf.xlu1 }
 0x2d3   :  { %617 = vmatmul.mubr.msk.bf16.vlgmr.msra.gmra.mrb[4].mxu1 %vm176_vm2, %v273_v42 }
 0x2d4   :  { %629 = vmatpush3.bf16.msra.mxu1 %v657_v41  ;;  %632 = vmatprep.mubr.msk.bf16.mxu1 %vm822_vm0, %v821_v0 }
 0x2d5   :  { %630 = vmatprep.subr.bf16.mxu1 %v821_v0  ;;  %623 = vmatpush3.bf16.msra.mxu0 %v660_v45 }
 0x2d6   :  { %636 = vmatprep.subr.bf16.mxu0 %v821_v0 }
 0x2d8   :  { %631 = vmatpush3.bf16.msra.mxu1 %v659_v43 }
 0x2db   :  { %633 = vmatmul.mubr.msk.bf16.vlgmr.msra.gmra.mrb[8].mxu1 %vm87_vm1, %v326_v44 }
 0x3a2   :  { %v259_v46 = vpop.f32.mrb[4].mxu0 }
 0x3a3   :  { %v612_v47 = vpop.f32.mrb[5].mxu0 }
 0x3a4   :  { %v262_v48 = vpop.f32.mrb[6].mxu0 }
 0x3a5   :  { %v613_v49 = vpop.f32.mrb[7].mxu0 }
 0x3a6   :  { %v320_v50 = vpop.f32.mrb[4].mxu1 }
 0x3a7   :  { %v331_v51 = vpack.c.bf16 %v320_v50, %v259_v46  ;;  %v618_v52 = vpop.f32.mrb[5].mxu1 }
 0x3a8   :  { %v323_v53 = vpop.f32.mrb[6].mxu1 }
 0x3a9   :  { %v619_v54 = vpop.f32.mrb[7].mxu1  ;;  %625 = vmatmul.mubr.msk.bf16.vlgmr.msra.gmra.mrb[8].mxu0 %vm87_vm1, %v331_v51 }
 0x3aa   :  { %640 = vmatprep.mubr.msk.bf16.mxu0 %vm822_vm0, %v821_v0  ;;  %637 = vmatpush3.bf16.msra.mxu0 %v661_v59 }
 0x3ab   :  { %638 = vmatprep.subr.bf16.mxu0 %v821_v0 }
 0x3ae   :  { %v441_v55 = vpop.f32.mrb[8].mxu1  ;;  %639 = vmatpush3.bf16.msra.mxu0 %v662_v60 }
 0x3af   :  { %v634_v56 = vpop.f32.mrb[9].mxu1 }
 0x3b0   :  { %v444_v57 = vpop.f32.mrb[10].mxu1 }
 0x3b1   :  { %v635_v58 = vpop.f32.mrb[11].mxu1 }
 0x47c   :  { %v385_v61 = vpop.f32.mrb[8].mxu0 }
 0x47d   :  { %v442_v63 = vadd.f32 %v441_v55, %v385_v61  ;;  %v626_v3 = vpop.f32.mrb[9].mxu0 }
 0x47e   :  { %v388_v4 = vpop.f32.mrb[10].mxu0 }
 0x47f   :  { %v455_v5 = vadd.f32 %v574_v62, %v442_v63  ;;  %v445_v6 = vadd.f32 %v444_v57, %v388_v4  ;;  %v627_v7 = vpop.f32.mrb[11].mxu0 }
 0x481   :  { %v456_v8 = vadd.f32 %v574_v62, %v445_v6  ;;  %v457_v9 = vadd.f32 %v455_v5, %v938_v1 }
 0x483   :  { %v458_v10 = vadd.f32 %v456_v8, %v940_v2 }
 0x485   :  { %v459_v11 = vpack.c.bf16 %v458_v10, %v457_v9 }
 0x487   :  { %641 = vmatmul.mubr.msk.bf16.vlgmr.msra.gmra.mrb[12].mxu0 %vm87_vm1, %v459_v11 }
 0x488   :  { %770 = shalt.err (!%p767_p8)
}
 0x489   :  { %s771_s10 = scalar_lea.hbm %s1028_s7, 256 }
 0x48a   :  { %p772_p9 = scmp.ne.s32.totalorder %s1028_s7, %s771_s10  ;;  %p775_p10 = scmp.lt.u32.totalorder %s771_s10, %s1028_s7 }
 0x48c   :  { %p777_p11 = pnand %p775_p10, %p772_p9 }
 0x48e   :  { %780 = shalt.err (!%p777_p11)
}
 0x48f   :  { %552 = dma.vmem_to_hbm [thread:$0]  %s547_s30, 256, %s1028_s7, [#allocation12], %s817_s1, %s817_s1, %s818_s25  }
 0x490   :  { %v575_v0 = vld [vmem:[%s1026_s5] ss:$0 sm:$0xff]  ;;  %s824_s20 = smov [#allocation10]  }
 0x491   :  { %s534_s21 = sshll.u32 %s824_s20, 4  ;;  %s535_s21 = int_to_ptr.vmem [resolvable:$true] %s534_s21 }
 0x492   :  { %s781_s22 = scalar_lea.vmem %s535_s21, 256  ;;  %p786_p13 = scmp.lt.s32.totalorder %s535_s21, %s535_s21 }
 0x493   :  { %p782_p12 = scmp.ne.s32.totalorder %s535_s21, %s781_s22  ;;  %p787_p0 = scmp.lt.s32.totalorder %s781_s22, %s781_s22 }
 0x495   :  { %p788_p1 = por %p787_p0, %p786_p13 }
 0x497   :  { %p789_p2 = pnand %p788_p1, %p782_p12 }
 0x55a   :  { %v520_v1 = vpop.f32.mrb[12].mxu0 }
 0x55b   :  { %v521_v2 = vadd.f32 %v575_v0, %v520_v1  ;;  %v642_v12 = vpop.f32.mrb[13].mxu0 }
 0x55c   :  { %v523_v13 = vpop.f32.mrb[14].mxu0 }
 0x55d   :  { %527 = vst.msk [vmem:[#allocation10] sm:$0xff] %vm87_vm1, %v521_v2  ;;  %v524_v14 = vadd.f32 %v575_v0, %v523_v13  ;;  %v643_v15 = vpop.f32.mrb[15].mxu0 }
 0x55f   :  { %528 = vst.msk [vmem:[#allocation10 + $0x8] sm:$0xff] %vm87_vm1, %v524_v14 }
 0x560   :  { %792 = shalt.err (!%p789_p2)
}
 0x561   :  { %s793_s23 = scalar_lea.hbm %s1027_s6, 256 }
 0x562   :  { %p794_p3 = scmp.ne.s32.totalorder %s1027_s6, %s793_s23  ;;  %p797_p4 = scmp.lt.u32.totalorder %s793_s23, %s1027_s6 }
 0x564   :  { %p799_p5 = pnand %p797_p4, %p794_p3 }
 0x566   :  { %802 = shalt.err (!%p799_p5)
}
 0x567   :  { %540 = dma.vmem_to_hbm [thread:$0]  %s535_s21, 256, %s1027_s6, [#allocation4], %s817_s1, %s817_s1, %s818_s25  }
 0x568   :  { %809 = dma.done.wait [#allocation4], 256  }
 0x569   :  { %810 = vsyncadd [#allocation4], 4294967040 }
 0x56a   :  { %811 = dma.done.wait [#allocation12], 256  }
 0x56b   :  { %812 = vsyncadd [#allocation12], 4294967040 }
 0x56c   :  { %559 = vsyncpa [#allocation3], 1 }
 0x56d   :  { %560 = vsyncpa [#allocation6], 1 }
 0x56e   :  { %561 = vsyncpa [#allocation9], 1 }
 0x56f   :  { %562 = vsyncpa [#allocation4], 1 }
 0x570   :  { %563 = vsyncpa [#allocation12], 1 }

</bundles_post_ra>
